<compile_context>
chip_gen: v5e
topology: v5e:2x2
jax: 0.10.0
libtpu: 0.0.40
codegen_flags: <defaults>
</compile_context>

<pallas_src>
import functools

import jax
import jax.numpy as jnp
from jax.experimental import pallas as pl
from jax.experimental.pallas import tpu as pltpu


# ----------------------------------------------------------------------------
# VMEM budgets (generation aware).
# ----------------------------------------------------------------------------
def _vmem_budgets():
    try:
        cap = int(pltpu.get_tpu_info().vmem_capacity_bytes)
    except Exception:
        cap = 64 * 1024 * 1024                    # conservative: v7x per-core VMEM
    # (scoped vmem limit for Mosaic, working-set budget used to pick the tile)
    return int(cap * 0.75), int(cap * 0.50)


def _pick_tile_rows(H, W, C, CP, Ci, budget_bytes):
    """Largest row-tile TH (divisor of H) whose pass-1 working set fits the budget."""
    def est(th):
        thp = th + 4
        inp = 2 * thp * (W + 4) * C * 2                    # double-buffered bf16 input tile
        slab = thp * W * 5 * CP * 2                        # bf16 shift slab (scratch)
        acc = th * W * 2 * C * 4                           # f32 conv accumulator
        epi = 4 * th * W * C * 4                           # f32 y / xa / zl / xl temporaries
        outs = 2 * 3 * th * W * C * 2                      # double-buffered bf16 x1/x2/xl
        wts = 2 * (5 * 5 * CP * 2 * C + 2 * C * Ci) * 2    # double-buffered bf16 weights
        return inp + slab + acc + epi + outs + wts
    cands = [th for th in range(H, 0, -1)
             if H % th == 0 and (th == H or (th * W) % 16 == 0)]
    for th in cands:
        if est(th) <= budget_bytes:
            return th
    return cands[-1]


def _param_spec(a):
    zeros = (0,) * a.ndim
    return pl.BlockSpec(a.shape, lambda *_idx, _z=zeros: _z)


# ----------------------------------------------------------------------------
# Shared conv + local-attention core (operates on one row tile).
# ----------------------------------------------------------------------------
def _conv_local(xin_ref, slab_ref, wt_ref, sc12_ref, sh12_ref,
                wl1_ref, sl1_ref, tl1_ref, wl2_ref, sl2_ref, tl2_ref,
                *, th, w, c, cp):
    # xin_ref : (th+4, w+4, c)   bf16  row-haloed, column-padded |x - r| tile
    # slab_ref: (th+4, w, 5*cp)  bf16  dx-shift slab, lane-aligned slots of width cp
    # wt_ref  : (5, 5*cp, 2c)    bf16  per-dy fused [w3(embedded) | w5] weights
    for dx in range(5):
        slab_ref[:, :, dx * cp:dx * cp + c] = xin_ref[:, dx:dx + w, :]

    # 5 MXU matmuls (one per dy), K = 5*cp, f32 accumulation.
    acc = jnp.zeros((th * w, 2 * c), jnp.float32)
    for dy in range(5):
        lhs = slab_ref[dy:dy + th, :, :].reshape(th * w, 5 * cp)
        acc = acc + jnp.dot(lhs, wt_ref[dy], preferred_element_type=jnp.float32)

    # Folded eval-mode BN + ReLU for both conv branches at once.
    y = jnp.maximum(acc * sc12_ref[...] + sh12_ref[...], 0.0)   # (th*w, 2c) f32
    x1 = y[:, :c]
    x2 = y[:, c:]
    xa = x1 + x2

    # local_att: 1x1 conv -> BN -> ReLU -> 1x1 conv -> BN (bf16 MXU, f32 epilogue).
    zl = jnp.maximum(
        jnp.dot(xa.astype(jnp.bfloat16), wl1_ref[...],
                preferred_element_type=jnp.float32) * sl1_ref[...] + tl1_ref[...],
        0.0)
    xl = (jnp.dot(zl.astype(jnp.bfloat16), wl2_ref[...],
                  preferred_element_type=jnp.float32) * sl2_ref[...] + tl2_ref[...])
    return x1, x2, xl, xa


# ----------------------------------------------------------------------------
# Fully fused kernel (whole image per grid step).
# ----------------------------------------------------------------------------
def _fused_kernel(xin_ref, wt_ref, sc12_ref, sh12_ref,
                  wl1_ref, sl1_ref, tl1_ref, wl2_ref, sl2_ref, tl2_ref,
                  wg1_ref, sg1_ref, tg1_ref, wg2_ref, sg2_ref, tg2_ref,
                  o_ref, slab_ref, *, th, w, c, cp, inv_hw):
    if cp != c:
        # Pad lanes feed zero weight rows, but uninitialized VMEM could be
        # NaN/Inf (NaN * 0 = NaN) -> zero them.
        slab_ref[...] = jnp.zeros_like(slab_ref)

    x1, x2, xl, xa = _conv_local(
        xin_ref, slab_ref, wt_ref, sc12_ref, sh12_ref,
        wl1_ref, sl1_ref, tl1_ref, wl2_ref, sl2_ref, tl2_ref,
        th=th, w=w, c=c, cp=cp)

    # global_att: GAP over the whole image -> MLP -> per-image bias.
    gap = jnp.sum(xa, axis=0, keepdims=True) * inv_hw            # (1, c) f32
    zg = jnp.maximum(
        jnp.dot(gap, wg1_ref[...], preferred_element_type=jnp.float32)
        * sg1_ref[...] + tg1_ref[...], 0.0)
    xg = (jnp.dot(zg, wg2_ref[...], preferred_element_type=jnp.float32)
          * sg2_ref[...] + tg2_ref[...])                         # (1, c)

    wei = jax.nn.sigmoid(xl + xg)                                # (hw, c) f32
    # 2*x1*wei + 2*x2*(1-wei) == 2*x2 + 2*(x1-x2)*wei
    o_ref[...] = (2.0 * x2 + 2.0 * (x1 - x2) * wei).astype(o_ref.dtype)


# ----------------------------------------------------------------------------
# Tiled fallback, pass 1: convs + local att + GAP partial sum.
# ----------------------------------------------------------------------------
def _pass1_kernel(xin_ref, wt_ref, sc12_ref, sh12_ref,
                  wl1_ref, sl1_ref, tl1_ref, wl2_ref, sl2_ref, tl2_ref,
                  x1_ref, x2_ref, xl_ref, gap_ref, slab_ref, *, th, w, c, cp):
    t = pl.program_id(1)

    if cp != c:
        @pl.when(t == 0)
        def _zero_slab():
            slab_ref[...] = jnp.zeros_like(slab_ref)

    x1, x2, xl, xa = _conv_local(
        xin_ref, slab_ref, wt_ref, sc12_ref, sh12_ref,
        wl1_ref, sl1_ref, tl1_ref, wl2_ref, sl2_ref, tl2_ref,
        th=th, w=w, c=c, cp=cp)

    # bf16 intermediates (halves pass-1 store + pass-2 load HBM traffic).
    x1_ref[...] = x1.astype(x1_ref.dtype)
    x2_ref[...] = x2.astype(x2_ref.dtype)
    xl_ref[...] = xl.astype(xl_ref.dtype)

    # GAP partial sum, accumulated across the trailing "arbitrary" tile axis.
    @pl.when(t == 0)
    def _init_gap():
        gap_ref[...] = jnp.zeros_like(gap_ref)

    gap_ref[...] += jnp.sum(xa, axis=0, keepdims=True)


# ----------------------------------------------------------------------------
# Tiled fallback, pass 2: sigmoid gate + blend (global MLP hoisted to JAX).
# ----------------------------------------------------------------------------
def _pass2_kernel(x1_ref, x2_ref, xl_ref, xg_ref, o_ref):
    x1 = x1_ref[...].astype(jnp.float32)
    x2 = x2_ref[...].astype(jnp.float32)
    wei = jax.nn.sigmoid(xl_ref[...].astype(jnp.float32) + xg_ref[...])
    o_ref[...] = (2.0 * x2 + 2.0 * (x1 - x2) * wei).astype(o_ref.dtype)


# ----------------------------------------------------------------------------
# Wrapper.
# ----------------------------------------------------------------------------
def abs_aff_pallas(x_nchw, res_nchw, p, *, force_tile_rows=None):
    B, C, H, W = x_nchw.shape
    HW = H * W
    Wp = W + 4
    Ci = p['wl1'].shape[1]
    CP = ((C + 127) // 128) * 128              # lane-aligned per-dx K slot

    vmem_limit, tile_budget = _vmem_budgets()
    TH = (force_tile_rows if force_tile_rows is not None
          else _pick_tile_rows(H, W, C, CP, Ci, tile_budget))
    assert H % TH == 0 and (TH == H or (TH * W) % 16 == 0)
    n_t = H // TH
    THp = TH + 4

    # |x - r| once (f32), cast to bf16, pad; XLA fuses sub/abs/cast/pad.
    x = jnp.transpose(x_nchw, (0, 2, 3, 1)).astype(jnp.float32)
    r = jnp.transpose(res_nchw, (0, 2, 3, 1)).astype(jnp.float32)
    xabs = jnp.abs(x - r).astype(jnp.bfloat16)
    xpad = jnp.pad(xabs, ((0, 0), (2, 2), (2, 2), (0, 0)))       # (B, H+4, W+4, C)

    # Fused per-dy conv weights: 3x3 embedded into the 5x5 window, dx-major K
    # layout with lane-aligned slots of width CP (zero rows in the padding).
    w3e = jnp.zeros((5, 5, C, C), jnp.float32).at[1:4, 1:4, :, :].set(p['w3'])
    w_all = jnp.concatenate([w3e, p['w5']], axis=-1)             # (5, 5, C, 2C)
    w_taps = (jnp.zeros((5, 5, CP, 2 * C), jnp.float32)
              .at[:, :, :C, :].set(w_all)
              .reshape(5, 5 * CP, 2 * C).astype(jnp.bfloat16))
    scale12 = jnp.concatenate([p['s3'], p['s5']], axis=-1)       # (1, 2C) f32
    shift12 = jnp.concatenate([p['t3'], p['t5']], axis=-1)
    wl1 = p['wl1'].astype(jnp.bfloat16)
    wl2 = p['wl2'].astype(jnp.bfloat16)

    conv_params = [w_taps, scale12, shift12,
                   wl1, p['sl1'], p['tl1'], wl2, p['sl2'], p['tl2']]
    slab_scratch = pltpu.VMEM((THp, W, 5 * CP), jnp.bfloat16)

    if n_t == 1:
        # ---- fully fused single-pass path ----------------------------------
        glob_params = [p['wg1'], p['sg1'], p['tg1'], p['wg2'], p['sg2'], p['tg2']]
        out = pl.pallas_call(
            functools.partial(_fused_kernel, th=TH, w=W, c=C, cp=CP, inv_hw=1.0 / HW),
            out_shape=jax.ShapeDtypeStruct((B, HW, C), jnp.float32),
            grid_spec=pltpu.PrefetchScalarGridSpec(
                num_scalar_prefetch=0,
                grid=(B,),
                in_specs=[pl.BlockSpec((None, H + 4, Wp, C), lambda b: (b, 0, 0, 0))]
                         + [_param_spec(a) for a in conv_params + glob_params],
                out_specs=pl.BlockSpec((None, HW, C), lambda b: (b, 0, 0)),
                scratch_shapes=[slab_scratch]),
            compiler_params=pltpu.CompilerParams(
                dimension_semantics=("parallel",),
                vmem_limit_bytes=vmem_limit),
        )(xpad, *conv_params, *glob_params)
    else:
        # ---- tiled two-pass fallback ---------------------------------------
        # Row-haloed tiles (only 4 duplicated rows per tile, not 5x the image).
        xtiles = jnp.stack([xpad[:, t * TH:t * TH + THp] for t in range(n_t)],
                           axis=1)                               # (B, n_t, TH+4, W+4, C)

        def tile_spec():
            return pl.BlockSpec((None, TH * W, C), lambda b, t: (b, t, 0))

        def vec_spec():
            return pl.BlockSpec((None, 1, C), lambda b, t: (b, 0, 0))

        x1f, x2f, xlf, gap = pl.pallas_call(
            functools.partial(_pass1_kernel, th=TH, w=W, c=C, cp=CP),
            out_shape=(jax.ShapeDtypeStruct((B, HW, C), jnp.bfloat16),
                       jax.ShapeDtypeStruct((B, HW, C), jnp.bfloat16),
                       jax.ShapeDtypeStruct((B, HW, C), jnp.bfloat16),
                       jax.ShapeDtypeStruct((B, 1, C), jnp.float32)),
            grid_spec=pltpu.PrefetchScalarGridSpec(
                num_scalar_prefetch=0,
                grid=(B, n_t),
                in_specs=[pl.BlockSpec((None, None, THp, Wp, C),
                                       lambda b, t: (b, t, 0, 0, 0))]
                         + [_param_spec(a) for a in conv_params],
                out_specs=(tile_spec(), tile_spec(), tile_spec(), vec_spec()),
                scratch_shapes=[slab_scratch]),
            compiler_params=pltpu.CompilerParams(
                # GAP accumulates across t: it MUST stay the trailing "arbitrary" axis.
                dimension_semantics=("parallel", "arbitrary"),
                vmem_limit_bytes=vmem_limit),
        )(xtiles, *conv_params)

        # Hoisted global-att MLP (M=1 matmul -> plain JAX, computed once per image).
        gap_mean = gap * (1.0 / HW)                              # (B, 1, C)
        zg = jax.nn.relu(jnp.einsum('bic,cd->bid', gap_mean, p['wg1'])
                         * p['sg1'] + p['tg1'])
        xg = jnp.einsum('bid,dc->bic', zg, p['wg2']) * p['sg2'] + p['tg2']

        out = pl.pallas_call(
            _pass2_kernel,
            out_shape=jax.ShapeDtypeStruct((B, HW, C), jnp.float32),
            grid_spec=pltpu.PrefetchScalarGridSpec(
                num_scalar_prefetch=0,
                grid=(B, n_t),
                in_specs=[tile_spec(), tile_spec(), tile_spec(), vec_spec()],
                out_specs=tile_spec()),
            compiler_params=pltpu.CompilerParams(
                dimension_semantics=("parallel", "parallel"),
                vmem_limit_bytes=vmem_limit),
        )(x1f, x2f, xlf, xg)

    return jnp.transpose(out.reshape(B, H, W, C), (0, 3, 1, 2))


# ----------------------------------------------------------------------------
# Deterministic synthetic parameters (eval-mode BN folded to scale/shift).
# ----------------------------------------------------------------------------
def _bn_affine(key, n, conv_bias):
    k1, k2, k3, k4 = jax.random.split(key, 4)
    gamma = jax.random.uniform(k1, (n,), jnp.float32, 0.5, 1.5)
    beta = jax.random.uniform(k2, (n,), jnp.float32, -0.2, 0.2)
    mu = jax.random.uniform(k3, (n,), jnp.float32, -0.1, 0.1)
    var = jax.random.uniform(k4, (n,), jnp.float32, 0.5, 1.5)
    scale = gamma / jnp.sqrt(var + 1e-5)
    shift = beta + (conv_bias - mu) * scale
    return scale.reshape(1, n), shift.reshape(1, n)


def init_params(key, C, r=4):
    Ci = max(C // r, 1)
    ks = jax.random.split(key, 16)
    nrm = jax.random.normal
    p = {}
    p['w3'] = nrm(ks[0], (3, 3, C, C), jnp.float32) / jnp.sqrt(9 * C)
    p['w5'] = nrm(ks[1], (5, 5, C, C), jnp.float32) / jnp.sqrt(25 * C)
    p['s3'], p['t3'] = _bn_affine(ks[2], C, jnp.zeros((C,), jnp.float32))
    p['s5'], p['t5'] = _bn_affine(ks[3], C, jnp.zeros((C,), jnp.float32))
    p['wl1'] = nrm(ks[4], (C, Ci), jnp.float32) / jnp.sqrt(C)
    p['sl1'], p['tl1'] = _bn_affine(ks[6], Ci, 0.05 * nrm(ks[5], (Ci,), jnp.float32))
    p['wl2'] = nrm(ks[7], (Ci, C), jnp.float32) / jnp.sqrt(Ci)
    p['sl2'], p['tl2'] = _bn_affine(ks[9], C, 0.05 * nrm(ks[8], (C,), jnp.float32))
    p['wg1'] = nrm(ks[10], (C, Ci), jnp.float32) / jnp.sqrt(C)
    p['sg1'], p['tg1'] = _bn_affine(ks[12], Ci, 0.05 * nrm(ks[11], (Ci,), jnp.float32))
    p['wg2'] = nrm(ks[13], (Ci, C), jnp.float32) / jnp.sqrt(Ci)
    p['sg2'], p['tg2'] = _bn_affine(ks[15], C, 0.05 * nrm(ks[14], (C,), jnp.float32))
    return p


# ----------------------------------------------------------------------------
# Pure-JAX f32 reference (verification only).
# ----------------------------------------------------------------------------
def _conv_nhwc(x, w_hwio):
    return jax.lax.conv_general_dilated(
        x, w_hwio, (1, 1), 'SAME',
        dimension_numbers=('NHWC', 'HWIO', 'NHWC'))


def reference_nchw(x_nchw, res_nchw, p):
    x = jnp.transpose(x_nchw, (0, 2, 3, 1)).astype(jnp.float32)
    r = jnp.transpose(res_nchw, (0, 2, 3, 1)).astype(jnp.float32)
    xabs = jnp.abs(x - r)
    x1 = jax.nn.relu(_conv_nhwc(xabs, p['w3']) * p['s3'] + p['t3'])
    x2 = jax.nn.relu(_conv_nhwc(xabs, p['w5']) * p['s5'] + p['t5'])
    xa = x1 + x2
    zl = jax.nn.relu(jnp.einsum('bhwc,cd->bhwd', xa, p['wl1']) * p['sl1'] + p['tl1'])
    xl = jnp.einsum('bhwd,dc->bhwc', zl, p['wl2']) * p['sl2'] + p['tl2']
    g = jnp.mean(xa, axis=(1, 2))
    zg = jax.nn.relu(g @ p['wg1'] * p['sg1'] + p['tg1'])
    xg = (zg @ p['wg2'] * p['sg2'] + p['tg2'])[:, None, None, :]
    wei = jax.nn.sigmoid(xl + xg)
    xo = 2.0 * x1 * wei + 2.0 * x2 * (1.0 - wei)
    return jnp.transpose(xo, (0, 3, 1, 2))


def _check(out, ref, label):
    assert out.shape == ref.shape, (label, out.shape, ref.shape)
    max_err = float(jnp.max(jnp.abs(out - ref)))
    mean_err = float(jnp.mean(jnp.abs(out - ref)))
    # Tolerances sized for bf16 MXU operands (plus bf16 intermediates in the
    # tiled path) vs a pure-f32 reference; a real bug produces O(1) errors.
    if not (jnp.allclose(out, ref, atol=1e-1, rtol=1e-1) and mean_err < 2.5e-2):
        raise AssertionError(
            f"{label}: Pallas kernel mismatch vs reference: "
            f"max_err={max_err}, mean_err={mean_err}")


if __name__ == "__main__":
    key = jax.random.PRNGKey(0)
    B, C, H, W = 2, 8, 16, 16            # channels=8 -> inter_channels=2 (r=4)
    kx, kr, kp = jax.random.split(key, 3)
    x = jax.random.normal(kx, (B, C, H, W), jnp.float32)
    residual = jax.random.normal(kr, (B, C, H, W), jnp.float32)
    params = init_params(kp, C, r=4)

    ref = reference_nchw(x, residual, params)

    # Fully fused single-pass path (whole image fits the VMEM budget).
    fused = jax.jit(abs_aff_pallas)
    out_fused = jax.block_until_ready(fused(x, residual, params))
    _check(out_fused, ref, "fused")

    # Tiled two-pass fallback (forced) to exercise halo tiling, the GAP
    # accumulator over the arbitrary axis and the bf16 intermediates.
    tiled = jax.jit(functools.partial(abs_aff_pallas, force_tile_rows=8))
    out_tiled = jax.block_until_ready(tiled(x, residual, params))
    _check(out_tiled, ref, "tiled")

    print("KERNEL_OK")
</pallas_src>

<mosaic_0001>
module attributes {stable_mosaic.version = 11 : i64} {
  func.func @_fused_kernel(%arg0: i32, %arg1: memref<1x20x20x8xbf16, #tpu.memory_space<vmem>>, %arg2: memref<5x640x16xbf16, #tpu.memory_space<vmem>>, %arg3: memref<1x16xf32, #tpu.memory_space<vmem>>, %arg4: memref<1x16xf32, #tpu.memory_space<vmem>>, %arg5: memref<8x2xbf16, #tpu.memory_space<vmem>>, %arg6: memref<1x2xf32, #tpu.memory_space<vmem>>, %arg7: memref<1x2xf32, #tpu.memory_space<vmem>>, %arg8: memref<2x8xbf16, #tpu.memory_space<vmem>>, %arg9: memref<1x8xf32, #tpu.memory_space<vmem>>, %arg10: memref<1x8xf32, #tpu.memory_space<vmem>>, %arg11: memref<8x2xf32, #tpu.memory_space<vmem>>, %arg12: memref<1x2xf32, #tpu.memory_space<vmem>>, %arg13: memref<1x2xf32, #tpu.memory_space<vmem>>, %arg14: memref<2x8xf32, #tpu.memory_space<vmem>>, %arg15: memref<1x8xf32, #tpu.memory_space<vmem>>, %arg16: memref<1x8xf32, #tpu.memory_space<vmem>>, %arg17: memref<1x256x8xf32, #tpu.memory_space<vmem>>, %arg18: memref<20x16x640xbf16, #tpu.memory_space<vmem>>) attributes {dimension_semantics = [#tpu.dimension_semantics<parallel>], iteration_bounds = array<i64: 2>, scalar_prefetch = 0 : i64, scratch_operands = 1 : i64, tpu.core_type = #tpu.core_type<tc>, window_params = [{transform_indices = @transform_0, window_bounds = array<i64: 1, 20, 20, 8>}, {pipeline_mode = #tpu.pipeline_mode<synchronous>, transform_indices = @transform_1, window_bounds = array<i64: 5, 640, 16>}, {pipeline_mode = #tpu.pipeline_mode<synchronous>, transform_indices = @transform_2, window_bounds = array<i64: 1, 16>}, {pipeline_mode = #tpu.pipeline_mode<synchronous>, transform_indices = @transform_3, window_bounds = array<i64: 1, 16>}, {pipeline_mode = #tpu.pipeline_mode<synchronous>, transform_indices = @transform_4, window_bounds = array<i64: 8, 2>}, {pipeline_mode = #tpu.pipeline_mode<synchronous>, transform_indices = @transform_5, window_bounds = array<i64: 1, 2>}, {pipeline_mode = #tpu.pipeline_mode<synchronous>, transform_indices = @transform_6, window_bounds = array<i64: 1, 2>}, {pipeline_mode = #tpu.pipeline_mode<synchronous>, transform_indices = @transform_7, window_bounds = array<i64: 2, 8>}, {pipeline_mode = #tpu.pipeline_mode<synchronous>, transform_indices = @transform_8, window_bounds = array<i64: 1, 8>}, {pipeline_mode = #tpu.pipeline_mode<synchronous>, transform_indices = @transform_9, window_bounds = array<i64: 1, 8>}, {pipeline_mode = #tpu.pipeline_mode<synchronous>, transform_indices = @transform_10, window_bounds = array<i64: 8, 2>}, {pipeline_mode = #tpu.pipeline_mode<synchronous>, transform_indices = @transform_11, window_bounds = array<i64: 1, 2>}, {pipeline_mode = #tpu.pipeline_mode<synchronous>, transform_indices = @transform_12, window_bounds = array<i64: 1, 2>}, {pipeline_mode = #tpu.pipeline_mode<synchronous>, transform_indices = @transform_13, window_bounds = array<i64: 2, 8>}, {pipeline_mode = #tpu.pipeline_mode<synchronous>, transform_indices = @transform_14, window_bounds = array<i64: 1, 8>}, {pipeline_mode = #tpu.pipeline_mode<synchronous>, transform_indices = @transform_15, window_bounds = array<i64: 1, 8>}, {transform_indices = @transform_16, window_bounds = array<i64: 1, 256, 8>}]} {
    %cst = arith.constant 0.000000e+00 : bf16
    %0 = vector.broadcast %cst : bf16 to vector<20x16x640xbf16>
    %c0 = arith.constant 0 : index
    %c0_0 = arith.constant 0 : index
    %c0_1 = arith.constant 0 : index
    %1 = vector.load %arg18[%c0, %c0_0, %c0_1] : memref<20x16x640xbf16, #tpu.memory_space<vmem>>, vector<20x16x640xbf16>
    tpu.vector_store %arg18[%c0, %c0_0, %c0_1], %0 {strides = array<i32>} : memref<20x16x640xbf16, #tpu.memory_space<vmem>>, vector<20x16x640xbf16>,
    %c0_2 = arith.constant 0 : index
    %c0_3 = arith.constant 0 : index
    %c0_4 = arith.constant 0 : index
    %c0_5 = arith.constant 0 : index
    %2 = vector.load %arg1[%c0_2, %c0_3, %c0_4, %c0_5] : memref<1x20x20x8xbf16, #tpu.memory_space<vmem>>, vector<1x20x16x8xbf16>
    %3 = vector.shape_cast %2 : vector<1x20x16x8xbf16> to vector<20x16x8xbf16>
    %c0_6 = arith.constant 0 : index
    %c0_7 = arith.constant 0 : index
    %c0_8 = arith.constant 0 : index
    %4 = vector.load %arg18[%c0_6, %c0_7, %c0_8] : memref<20x16x640xbf16, #tpu.memory_space<vmem>>, vector<20x16x8xbf16>
    tpu.vector_store %arg18[%c0_6, %c0_7, %c0_8], %3 {strides = array<i32>} : memref<20x16x640xbf16, #tpu.memory_space<vmem>>, vector<20x16x8xbf16>,
    %c0_9 = arith.constant 0 : index
    %c0_10 = arith.constant 0 : index
    %c1 = arith.constant 1 : index
    %c0_11 = arith.constant 0 : index
    %5 = vector.load %arg1[%c0_9, %c0_10, %c1, %c0_11] : memref<1x20x20x8xbf16, #tpu.memory_space<vmem>>, vector<1x20x16x8xbf16>
    %6 = vector.shape_cast %5 : vector<1x20x16x8xbf16> to vector<20x16x8xbf16>
    %c0_12 = arith.constant 0 : index
    %c0_13 = arith.constant 0 : index
    %c128 = arith.constant 128 : index
    %7 = vector.load %arg18[%c0_12, %c0_13, %c128] : memref<20x16x640xbf16, #tpu.memory_space<vmem>>, vector<20x16x8xbf16>
    tpu.vector_store %arg18[%c0_12, %c0_13, %c128], %6 {strides = array<i32>} : memref<20x16x640xbf16, #tpu.memory_space<vmem>>, vector<20x16x8xbf16>,
    %c0_14 = arith.constant 0 : index
    %c0_15 = arith.constant 0 : index
    %c2 = arith.constant 2 : index
    %c0_16 = arith.constant 0 : index
    %8 = vector.load %arg1[%c0_14, %c0_15, %c2, %c0_16] : memref<1x20x20x8xbf16, #tpu.memory_space<vmem>>, vector<1x20x16x8xbf16>
    %9 = vector.shape_cast %8 : vector<1x20x16x8xbf16> to vector<20x16x8xbf16>
    %c0_17 = arith.constant 0 : index
    %c0_18 = arith.constant 0 : index
    %c256 = arith.constant 256 : index
    %10 = vector.load %arg18[%c0_17, %c0_18, %c256] : memref<20x16x640xbf16, #tpu.memory_space<vmem>>, vector<20x16x8xbf16>
    tpu.vector_store %arg18[%c0_17, %c0_18, %c256], %9 {strides = array<i32>} : memref<20x16x640xbf16, #tpu.memory_space<vmem>>, vector<20x16x8xbf16>,
    %c0_19 = arith.constant 0 : index
    %c0_20 = arith.constant 0 : index
    %c3 = arith.constant 3 : index
    %c0_21 = arith.constant 0 : index
    %11 = vector.load %arg1[%c0_19, %c0_20, %c3, %c0_21] : memref<1x20x20x8xbf16, #tpu.memory_space<vmem>>, vector<1x20x16x8xbf16>
    %12 = vector.shape_cast %11 : vector<1x20x16x8xbf16> to vector<20x16x8xbf16>
    %c0_22 = arith.constant 0 : index
    %c0_23 = arith.constant 0 : index
    %c384 = arith.constant 384 : index
    %13 = vector.load %arg18[%c0_22, %c0_23, %c384] : memref<20x16x640xbf16, #tpu.memory_space<vmem>>, vector<20x16x8xbf16>
    tpu.vector_store %arg18[%c0_22, %c0_23, %c384], %12 {strides = array<i32>} : memref<20x16x640xbf16, #tpu.memory_space<vmem>>, vector<20x16x8xbf16>,
    %c0_24 = arith.constant 0 : index
    %c0_25 = arith.constant 0 : index
    %c4 = arith.constant 4 : index
    %c0_26 = arith.constant 0 : index
    %14 = vector.load %arg1[%c0_24, %c0_25, %c4, %c0_26] : memref<1x20x20x8xbf16, #tpu.memory_space<vmem>>, vector<1x20x16x8xbf16>
    %15 = vector.shape_cast %14 : vector<1x20x16x8xbf16> to vector<20x16x8xbf16>
    %c0_27 = arith.constant 0 : index
    %c0_28 = arith.constant 0 : index
    %c512 = arith.constant 512 : index
    %16 = vector.load %arg18[%c0_27, %c0_28, %c512] : memref<20x16x640xbf16, #tpu.memory_space<vmem>>, vector<20x16x8xbf16>
    tpu.vector_store %arg18[%c0_27, %c0_28, %c512], %15 {strides = array<i32>} : memref<20x16x640xbf16, #tpu.memory_space<vmem>>, vector<20x16x8xbf16>,
    %cst_29 = arith.constant 0.000000e+00 : f32
    %17 = vector.broadcast %cst_29 : f32 to vector<256x16xf32>
    %c0_30 = arith.constant 0 : index
    %c0_31 = arith.constant 0 : index
    %c0_32 = arith.constant 0 : index
    %18 = vector.load %arg18[%c0_30, %c0_31, %c0_32] : memref<20x16x640xbf16, #tpu.memory_space<vmem>>, vector<16x16x640xbf16>
    %19 = vector.shape_cast %18 : vector<16x16x640xbf16> to vector<256x640xbf16>
    %c0_33 = arith.constant 0 : index
    %c0_34 = arith.constant 0 : index
    %c0_35 = arith.constant 0 : index
    %20 = vector.load %arg2[%c0_33, %c0_34, %c0_35] : memref<5x640x16xbf16, #tpu.memory_space<vmem>>, vector<1x640x16xbf16>
    %21 = vector.shape_cast %20 : vector<1x640x16xbf16> to vector<640x16xbf16>
    %cst_36 = arith.constant dense<0.000000e+00> : vector<256x16xf32>
    %22 = tpu.matmul %19, %21, %cst_36 {dimension_numbers = #tpu.dot_dimension_numbers<[1], [0], [0], [1], [0, 0, 1, 1], [], []>} : vector<256x640xbf16>, vector<640x16xbf16>, vector<256x16xf32> -> vector<256x16xf32>
    %23 = arith.addf %17, %22 : vector<256x16xf32>
    %c1_37 = arith.constant 1 : index
    %c0_38 = arith.constant 0 : index
    %c0_39 = arith.constant 0 : index
    %24 = vector.load %arg18[%c1_37, %c0_38, %c0_39] : memref<20x16x640xbf16, #tpu.memory_space<vmem>>, vector<16x16x640xbf16>
    %25 = vector.shape_cast %24 : vector<16x16x640xbf16> to vector<256x640xbf16>
    %c1_40 = arith.constant 1 : index
    %c0_41 = arith.constant 0 : index
    %c0_42 = arith.constant 0 : index
    %26 = vector.load %arg2[%c1_40, %c0_41, %c0_42] : memref<5x640x16xbf16, #tpu.memory_space<vmem>>, vector<1x640x16xbf16>
    %27 = vector.shape_cast %26 : vector<1x640x16xbf16> to vector<640x16xbf16>
    %cst_43 = arith.constant dense<0.000000e+00> : vector<256x16xf32>
    %28 = tpu.matmul %25, %27, %cst_43 {dimension_numbers = #tpu.dot_dimension_numbers<[1], [0], [0], [1], [0, 0, 1, 1], [], []>} : vector<256x640xbf16>, vector<640x16xbf16>, vector<256x16xf32> -> vector<256x16xf32>
    %29 = arith.addf %23, %28 : vector<256x16xf32>
    %c2_44 = arith.constant 2 : index
    %c0_45 = arith.constant 0 : index
    %c0_46 = arith.constant 0 : index
    %30 = vector.load %arg18[%c2_44, %c0_45, %c0_46] : memref<20x16x640xbf16, #tpu.memory_space<vmem>>, vector<16x16x640xbf16>
    %31 = vector.shape_cast %30 : vector<16x16x640xbf16> to vector<256x640xbf16>
    %c2_47 = arith.constant 2 : index
    %c0_48 = arith.constant 0 : index
    %c0_49 = arith.constant 0 : index
    %32 = vector.load %arg2[%c2_47, %c0_48, %c0_49] : memref<5x640x16xbf16, #tpu.memory_space<vmem>>, vector<1x640x16xbf16>
    %33 = vector.shape_cast %32 : vector<1x640x16xbf16> to vector<640x16xbf16>
    %cst_50 = arith.constant dense<0.000000e+00> : vector<256x16xf32>
    %34 = tpu.matmul %31, %33, %cst_50 {dimension_numbers = #tpu.dot_dimension_numbers<[1], [0], [0], [1], [0, 0, 1, 1], [], []>} : vector<256x640xbf16>, vector<640x16xbf16>, vector<256x16xf32> -> vector<256x16xf32>
    %35 = arith.addf %29, %34 : vector<256x16xf32>
    %c3_51 = arith.constant 3 : index
    %c0_52 = arith.constant 0 : index
    %c0_53 = arith.constant 0 : index
    %36 = vector.load %arg18[%c3_51, %c0_52, %c0_53] : memref<20x16x640xbf16, #tpu.memory_space<vmem>>, vector<16x16x640xbf16>
    %37 = vector.shape_cast %36 : vector<16x16x640xbf16> to vector<256x640xbf16>
    %c3_54 = arith.constant 3 : index
    %c0_55 = arith.constant 0 : index
    %c0_56 = arith.constant 0 : index
    %38 = vector.load %arg2[%c3_54, %c0_55, %c0_56] : memref<5x640x16xbf16, #tpu.memory_space<vmem>>, vector<1x640x16xbf16>
    %39 = vector.shape_cast %38 : vector<1x640x16xbf16> to vector<640x16xbf16>
    %cst_57 = arith.constant dense<0.000000e+00> : vector<256x16xf32>
    %40 = tpu.matmul %37, %39, %cst_57 {dimension_numbers = #tpu.dot_dimension_numbers<[1], [0], [0], [1], [0, 0, 1, 1], [], []>} : vector<256x640xbf16>, vector<640x16xbf16>, vector<256x16xf32> -> vector<256x16xf32>
    %41 = arith.addf %35, %40 : vector<256x16xf32>
    %c4_58 = arith.constant 4 : index
    %c0_59 = arith.constant 0 : index
    %c0_60 = arith.constant 0 : index
    %42 = vector.load %arg18[%c4_58, %c0_59, %c0_60] : memref<20x16x640xbf16, #tpu.memory_space<vmem>>, vector<16x16x640xbf16>
    %43 = vector.shape_cast %42 : vector<16x16x640xbf16> to vector<256x640xbf16>
    %c4_61 = arith.constant 4 : index
    %c0_62 = arith.constant 0 : index
    %c0_63 = arith.constant 0 : index
    %44 = vector.load %arg2[%c4_61, %c0_62, %c0_63] : memref<5x640x16xbf16, #tpu.memory_space<vmem>>, vector<1x640x16xbf16>
    %45 = vector.shape_cast %44 : vector<1x640x16xbf16> to vector<640x16xbf16>
    %cst_64 = arith.constant dense<0.000000e+00> : vector<256x16xf32>
    %46 = tpu.matmul %43, %45, %cst_64 {dimension_numbers = #tpu.dot_dimension_numbers<[1], [0], [0], [1], [0, 0, 1, 1], [], []>} : vector<256x640xbf16>, vector<640x16xbf16>, vector<256x16xf32> -> vector<256x16xf32>
    %47 = arith.addf %41, %46 : vector<256x16xf32>
    %c0_65 = arith.constant 0 : index
    %c0_66 = arith.constant 0 : index
    %48 = vector.load %arg3[%c0_65, %c0_66] : memref<1x16xf32, #tpu.memory_space<vmem>>, vector<1x16xf32>
    %49 = vector.broadcast %48 : vector<1x16xf32> to vector<256x16xf32>
    %50 = arith.mulf %47, %49 : vector<256x16xf32>
    %c0_67 = arith.constant 0 : index
    %c0_68 = arith.constant 0 : index
    %51 = vector.load %arg4[%c0_67, %c0_68] : memref<1x16xf32, #tpu.memory_space<vmem>>, vector<1x16xf32>
    %52 = vector.broadcast %51 : vector<1x16xf32> to vector<256x16xf32>
    %53 = arith.addf %50, %52 : vector<256x16xf32>
    %cst_69 = arith.constant 0.000000e+00 : f32
    %54 = vector.broadcast %cst_69 : f32 to vector<256x16xf32>
    %55 = arith.maximumf %53, %54 : vector<256x16xf32>
    %56 = vector.extract_strided_slice %55 {offsets = [0, 0], sizes = [256, 8], strides = [1, 1]} : vector<256x16xf32> to vector<256x8xf32>
    %57 = vector.extract_strided_slice %55 {offsets = [0, 8], sizes = [256, 8], strides = [1, 1]} : vector<256x16xf32> to vector<256x8xf32>
    %58 = arith.addf %56, %57 : vector<256x8xf32>
    %59 = arith.truncf %58 : vector<256x8xf32> to vector<256x8xbf16>
    %c0_70 = arith.constant 0 : index
    %c0_71 = arith.constant 0 : index
    %60 = vector.load %arg5[%c0_70, %c0_71] : memref<8x2xbf16, #tpu.memory_space<vmem>>, vector<8x2xbf16>
    %cst_72 = arith.constant dense<0.000000e+00> : vector<256x2xf32>
    %61 = tpu.matmul %59, %60, %cst_72 {dimension_numbers = #tpu.dot_dimension_numbers<[1], [0], [0], [1], [0, 0, 1, 1], [], []>} : vector<256x8xbf16>, vector<8x2xbf16>, vector<256x2xf32> -> vector<256x2xf32>
    %c0_73 = arith.constant 0 : index
    %c0_74 = arith.constant 0 : index
    %62 = vector.load %arg6[%c0_73, %c0_74] : memref<1x2xf32, #tpu.memory_space<vmem>>, vector<1x2xf32>
    %63 = vector.broadcast %62 : vector<1x2xf32> to vector<256x2xf32>
    %64 = arith.mulf %61, %63 : vector<256x2xf32>
    %c0_75 = arith.constant 0 : index
    %c0_76 = arith.constant 0 : index
    %65 = vector.load %arg7[%c0_75, %c0_76] : memref<1x2xf32, #tpu.memory_space<vmem>>, vector<1x2xf32>
    %66 = vector.broadcast %65 : vector<1x2xf32> to vector<256x2xf32>
    %67 = arith.addf %64, %66 : vector<256x2xf32>
    %cst_77 = arith.constant 0.000000e+00 : f32
    %68 = vector.broadcast %cst_77 : f32 to vector<256x2xf32>
    %69 = arith.maximumf %67, %68 : vector<256x2xf32>
    %70 = arith.truncf %69 : vector<256x2xf32> to vector<256x2xbf16>
    %c0_78 = arith.constant 0 : index
    %c0_79 = arith.constant 0 : index
    %71 = vector.load %arg8[%c0_78, %c0_79] : memref<2x8xbf16, #tpu.memory_space<vmem>>, vector<2x8xbf16>
    %cst_80 = arith.constant dense<0.000000e+00> : vector<256x8xf32>
    %72 = tpu.matmul %70, %71, %cst_80 {dimension_numbers = #tpu.dot_dimension_numbers<[1], [0], [0], [1], [0, 0, 1, 1], [], []>} : vector<256x2xbf16>, vector<2x8xbf16>, vector<256x8xf32> -> vector<256x8xf32>
    %c0_81 = arith.constant 0 : index
    %c0_82 = arith.constant 0 : index
    %73 = vector.load %arg9[%c0_81, %c0_82] : memref<1x8xf32, #tpu.memory_space<vmem>>, vector<1x8xf32>
    %74 = vector.broadcast %73 : vector<1x8xf32> to vector<256x8xf32>
    %75 = arith.mulf %72, %74 : vector<256x8xf32>
    %c0_83 = arith.constant 0 : index
    %c0_84 = arith.constant 0 : index
    %76 = vector.load %arg10[%c0_83, %c0_84] : memref<1x8xf32, #tpu.memory_space<vmem>>, vector<1x8xf32>
    %77 = vector.broadcast %76 : vector<1x8xf32> to vector<256x8xf32>
    %78 = arith.addf %75, %77 : vector<256x8xf32>
    %cst_85 = arith.constant dense<0.000000e+00> : vector<8xf32>
    %79 = vector.multi_reduction <add>, %58, %cst_85 [0] : vector<256x8xf32> to vector<8xf32>
    %80 = vector.shape_cast %79 : vector<8xf32> to vector<1x8xf32>
    %cst_86 = arith.constant 3.906250e-03 : f32
    %81 = vector.broadcast %cst_86 : f32 to vector<1x8xf32>
    %82 = arith.mulf %80, %81 : vector<1x8xf32>
    %c0_87 = arith.constant 0 : index
    %c0_88 = arith.constant 0 : index
    %83 = vector.load %arg11[%c0_87, %c0_88] : memref<8x2xf32, #tpu.memory_space<vmem>>, vector<8x2xf32>
    %cst_89 = arith.constant dense<0.000000e+00> : vector<1x2xf32>
    %84 = tpu.matmul %82, %83, %cst_89 {dimension_numbers = #tpu.dot_dimension_numbers<[1], [0], [0], [1], [0, 0, 1, 1], [], []>} : vector<1x8xf32>, vector<8x2xf32>, vector<1x2xf32> -> vector<1x2xf32>
    %c0_90 = arith.constant 0 : index
    %c0_91 = arith.constant 0 : index
    %85 = vector.load %arg12[%c0_90, %c0_91] : memref<1x2xf32, #tpu.memory_space<vmem>>, vector<1x2xf32>
    %86 = arith.mulf %84, %85 : vector<1x2xf32>
    %c0_92 = arith.constant 0 : index
    %c0_93 = arith.constant 0 : index
    %87 = vector.load %arg13[%c0_92, %c0_93] : memref<1x2xf32, #tpu.memory_space<vmem>>, vector<1x2xf32>
    %88 = arith.addf %86, %87 : vector<1x2xf32>
    %cst_94 = arith.constant 0.000000e+00 : f32
    %89 = vector.broadcast %cst_94 : f32 to vector<1x2xf32>
    %90 = arith.maximumf %88, %89 : vector<1x2xf32>
    %c0_95 = arith.constant 0 : index
    %c0_96 = arith.constant 0 : index
    %91 = vector.load %arg14[%c0_95, %c0_96] : memref<2x8xf32, #tpu.memory_space<vmem>>, vector<2x8xf32>
    %cst_97 = arith.constant dense<0.000000e+00> : vector<1x8xf32>
    %92 = tpu.matmul %90, %91, %cst_97 {dimension_numbers = #tpu.dot_dimension_numbers<[1], [0], [0], [1], [0, 0, 1, 1], [], []>} : vector<1x2xf32>, vector<2x8xf32>, vector<1x8xf32> -> vector<1x8xf32>
    %c0_98 = arith.constant 0 : index
    %c0_99 = arith.constant 0 : index
    %93 = vector.load %arg15[%c0_98, %c0_99] : memref<1x8xf32, #tpu.memory_space<vmem>>, vector<1x8xf32>
    %94 = arith.mulf %92, %93 : vector<1x8xf32>
    %c0_100 = arith.constant 0 : index
    %c0_101 = arith.constant 0 : index
    %95 = vector.load %arg16[%c0_100, %c0_101] : memref<1x8xf32, #tpu.memory_space<vmem>>, vector<1x8xf32>
    %96 = arith.addf %94, %95 : vector<1x8xf32>
    %97 = vector.broadcast %96 : vector<1x8xf32> to vector<256x8xf32>
    %98 = arith.addf %78, %97 : vector<256x8xf32>
    %99 = arith.negf %98 : vector<256x8xf32>
    %100 = math.exp %99 : vector<256x8xf32>
    %cst_102 = arith.constant 1.000000e+00 : f32
    %101 = vector.broadcast %cst_102 : f32 to vector<256x8xf32>
    %102 = arith.addf %101, %100 : vector<256x8xf32>
    %103 = arith.divf %101, %102 : vector<256x8xf32>
    %cst_103 = arith.constant 2.000000e+00 : f32
    %104 = vector.broadcast %cst_103 : f32 to vector<256x8xf32>
    %105 = arith.mulf %104, %57 : vector<256x8xf32>
    %106 = arith.subf %56, %57 : vector<256x8xf32>
    %cst_104 = arith.constant 2.000000e+00 : f32
    %107 = vector.broadcast %cst_104 : f32 to vector<256x8xf32>
    %108 = arith.mulf %107, %106 : vector<256x8xf32>
    %109 = arith.mulf %108, %103 : vector<256x8xf32>
    %110 = arith.addf %105, %109 : vector<256x8xf32>
    %c0_105 = arith.constant 0 : index
    %c0_106 = arith.constant 0 : index
    %c0_107 = arith.constant 0 : index
    %111 = vector.load %arg17[%c0_105, %c0_106, %c0_107] : memref<1x256x8xf32, #tpu.memory_space<vmem>>, vector<1x256x8xf32>
    %112 = vector.shape_cast %111 : vector<1x256x8xf32> to vector<256x8xf32>
    %113 = vector.shape_cast %110 : vector<256x8xf32> to vector<1x256x8xf32>
    tpu.vector_store %arg17[%c0_105, %c0_106, %c0_107], %113 {strides = array<i32>} : memref<1x256x8xf32, #tpu.memory_space<vmem>>, vector<1x256x8xf32>,
    return
  }
  func.func @transform_0(%arg0: i32) -> (i32, i32, i32, i32) {
    %c0_i32 = arith.constant 0 : i32
    %c0_i32_0 = arith.constant 0 : i32
    %c0_i32_1 = arith.constant 0 : i32
    %c0_i32_2 = arith.constant 0 : i32
    return %arg0, %c0_i32, %c0_i32_0, %c0_i32_1 : i32, i32, i32, i32
  }
  func.func @transform_1(%arg0: i32) -> (i32, i32, i32) {
    %c0_i32 = arith.constant 0 : i32
    %c0_i32_0 = arith.constant 0 : i32
    %c0_i32_1 = arith.constant 0 : i32
    %c0_i32_2 = arith.constant 0 : i32
    return %c0_i32, %c0_i32_0, %c0_i32_1 : i32, i32, i32
  }
  func.func @transform_2(%arg0: i32) -> (i32, i32) {
    %c0_i32 = arith.constant 0 : i32
    %c0_i32_0 = arith.constant 0 : i32
    %c0_i32_1 = arith.constant 0 : i32
    return %c0_i32, %c0_i32_0 : i32, i32
  }
  func.func @transform_3(%arg0: i32) -> (i32, i32) {
    %c0_i32 = arith.constant 0 : i32
    %c0_i32_0 = arith.constant 0 : i32
    %c0_i32_1 = arith.constant 0 : i32
    return %c0_i32, %c0_i32_0 : i32, i32
  }
  func.func @transform_4(%arg0: i32) -> (i32, i32) {
    %c0_i32 = arith.constant 0 : i32
    %c0_i32_0 = arith.constant 0 : i32
    %c0_i32_1 = arith.constant 0 : i32
    return %c0_i32, %c0_i32_0 : i32, i32
  }
  func.func @transform_5(%arg0: i32) -> (i32, i32) {
    %c0_i32 = arith.constant 0 : i32
    %c0_i32_0 = arith.constant 0 : i32
    %c0_i32_1 = arith.constant 0 : i32
    return %c0_i32, %c0_i32_0 : i32, i32
  }
  func.func @transform_6(%arg0: i32) -> (i32, i32) {
    %c0_i32 = arith.constant 0 : i32
    %c0_i32_0 = arith.constant 0 : i32
    %c0_i32_1 = arith.constant 0 : i32
    return %c0_i32, %c0_i32_0 : i32, i32
  }
  func.func @transform_7(%arg0: i32) -> (i32, i32) {
    %c0_i32 = arith.constant 0 : i32
    %c0_i32_0 = arith.constant 0 : i32
    %c0_i32_1 = arith.constant 0 : i32
    return %c0_i32, %c0_i32_0 : i32, i32
  }
  func.func @transform_8(%arg0: i32) -> (i32, i32) {
    %c0_i32 = arith.constant 0 : i32
    %c0_i32_0 = arith.constant 0 : i32
    %c0_i32_1 = arith.constant 0 : i32
    return %c0_i32, %c0_i32_0 : i32, i32
  }
  func.func @transform_9(%arg0: i32) -> (i32, i32) {
    %c0_i32 = arith.constant 0 : i32
    %c0_i32_0 = arith.constant 0 : i32
    %c0_i32_1 = arith.constant 0 : i32
    return %c0_i32, %c0_i32_0 : i32, i32
  }
  func.func @transform_10(%arg0: i32) -> (i32, i32) {
    %c0_i32 = arith.constant 0 : i32
    %c0_i32_0 = arith.constant 0 : i32
    %c0_i32_1 = arith.constant 0 : i32
    return %c0_i32, %c0_i32_0 : i32, i32
  }
  func.func @transform_11(%arg0: i32) -> (i32, i32) {
    %c0_i32 = arith.constant 0 : i32
    %c0_i32_0 = arith.constant 0 : i32
    %c0_i32_1 = arith.constant 0 : i32
    return %c0_i32, %c0_i32_0 : i32, i32
  }
  func.func @transform_12(%arg0: i32) -> (i32, i32) {
    %c0_i32 = arith.constant 0 : i32
    %c0_i32_0 = arith.constant 0 : i32
    %c0_i32_1 = arith.constant 0 : i32
    return %c0_i32, %c0_i32_0 : i32, i32
  }
  func.func @transform_13(%arg0: i32) -> (i32, i32) {
    %c0_i32 = arith.constant 0 : i32
    %c0_i32_0 = arith.constant 0 : i32
    %c0_i32_1 = arith.constant 0 : i32
    return %c0_i32, %c0_i32_0 : i32, i32
  }
  func.func @transform_14(%arg0: i32) -> (i32, i32) {
    %c0_i32 = arith.constant 0 : i32
    %c0_i32_0 = arith.constant 0 : i32
    %c0_i32_1 = arith.constant 0 : i32
    return %c0_i32, %c0_i32_0 : i32, i32
  }
  func.func @transform_15(%arg0: i32) -> (i32, i32) {
    %c0_i32 = arith.constant 0 : i32
    %c0_i32_0 = arith.constant 0 : i32
    %c0_i32_1 = arith.constant 0 : i32
    return %c0_i32, %c0_i32_0 : i32, i32
  }
  func.func @transform_16(%arg0: i32) -> (i32, i32, i32) {
    %c0_i32 = arith.constant 0 : i32
    %c0_i32_0 = arith.constant 0 : i32
    %c0_i32_1 = arith.constant 0 : i32
    return %arg0, %c0_i32, %c0_i32_0 : i32, i32, i32
  }
}

</mosaic_0001>

<bundles_post_ra>
// kernel: sub.0
= control target key start
LH: loop header
LB: loop body
LE: loop exit
PB: predicated region body
PF: predicated region fallthrough
CT: control target
= control target key end

     0   :  { %s748_s0 = inlined_call_operand.vmem [shape: f32[2,8,16,16], index: 0, kind: input, shape index: {}]   ;;  %s749_s1 = inlined_call_operand.vmem [shape: f32[2,8,16,16], index: 1, kind: input, shape index: {}]   ;;  %s750_s2 = inlined_call_operand.vmem [shape: bf16[2,8,16,16], index: 2, kind: output, shape index: {}]  }
   0x1   :  { %v3_v0 = vld [vmem:[%s748_s0] sm:$0xff]  ;;  %v355_v5 = vld [vmem:[%s748_s0 + $0x10] sm:$0xff]  ;;  %v397_v58 = vld [vmem:[%s748_s0 + $0x8] sm:$0xff] }
   0x2   :  { %v4_v1 = vld [vmem:[%s749_s1] sm:$0xff]  ;;  %v356_v6 = vld [vmem:[%s749_s1 + $0x10] sm:$0xff]  ;;  %v398_v59 = vld [vmem:[%s749_s1 + $0x8] sm:$0xff] }
   0x3   :  { %v352_v2 = vld [vmem:[%s748_s0 + $0x80] sm:$0xff]  ;;  %v7_v3 = vsub.f32 %v3_v0, %v4_v1  ;;  %v28_v8 = vsub.f32 %v355_v5, %v356_v6  ;;  %v358_v9 = vld [vmem:[%s748_s0 + $0x90] sm:$0xff]  ;;  %v182_v62 = vsub.f32 %v397_v58, %v398_v59  ;;  %v400_v63 = vld [vmem:[%s748_s0 + $0x88] sm:$0xff] }
   0x4   :  { %v353_v4 = vld [vmem:[%s749_s1 + $0x80] sm:$0xff]  ;;  %v359_v10 = vld [vmem:[%s749_s1 + $0x90] sm:$0xff]  ;;  %v401_v0 = vld [vmem:[%s749_s1 + $0x88] sm:$0xff] }
   0x5   :  { %v17_v7 = vsub.f32 %v352_v2, %v353_v4  ;;  %v361_v11 = vld [vmem:[%s748_s0 + $0x20] sm:$0xff]  ;;  %v9_v12 = vpack.c.bf16 0.0, %v7_v3  ;;  %v39_v13 = vsub.f32 %v358_v9, %v359_v10  ;;  %v31_v18 = vpack.c.bf16 0.0, %v28_v8  ;;  %v367_v21 = vld [vmem:[%s748_s0 + $0x30] sm:$0xff]  ;;  %v403_v3 = vld [vmem:[%s748_s0 + $0x18] sm:$0xff] }
   0x6   :  { %v362_v14 = vld [vmem:[%s749_s1 + $0x20] sm:$0xff]  ;;  %v368_v22 = vld [vmem:[%s749_s1 + $0x30] sm:$0xff]  ;;  %v193_v2 = vsub.f32 %v400_v63, %v401_v0  ;;  %v404_v4 = vld [vmem:[%s749_s1 + $0x18] sm:$0xff] }
   0x7   :  { %v364_v15 = vld [vmem:[%s748_s0 + $0xa0] sm:$0xff]  ;;  %v20_v17 = vpack.c.bf16 0.0, %v17_v7  ;;  %v50_v19 = vsub.f32 %v361_v11, %v362_v14  ;;  %v370_v23 = vld [vmem:[%s748_s0 + $0xb0] sm:$0xff]  ;;  %10 = vst [vmem:[%s750_s2] sm:$0xf] %v9_v12  ;;  %v42_v24 = vpack.c.bf16 0.0, %v39_v13  ;;  %v72_v25 = vsub.f32 %v367_v21, %v368_v22  ;;  %v406_v5 = vld [vmem:[%s748_s0 + $0x98] sm:$0xff] }
   0x8   :  { %v365_v16 = vld [vmem:[%s749_s1 + $0xa0] sm:$0xff]  ;;  %v371_v26 = vld [vmem:[%s749_s1 + $0xb0] sm:$0xff]  ;;  %357 = vst [vmem:[%s750_s2 + $0x8] sm:$0xf] %v31_v18  ;;  %v204_v7 = vsub.f32 %v403_v3, %v404_v4  ;;  %v407_v8 = vld [vmem:[%s749_s1 + $0x98] sm:$0xff]  ;;  %v185_v21 = vpack.c.bf16 0.0, %v182_v62 }
   0x9   :  { %v61_v20 = vsub.f32 %v364_v15, %v365_v16  ;;  %v373_v27 = vld [vmem:[%s748_s0 + $0x40] sm:$0xff]  ;;  %354 = vst [vmem:[%s750_s2 + $0x40] sm:$0xf] %v20_v17  ;;  %v53_v29 = vpack.c.bf16 0.0, %v50_v19  ;;  %v83_v31 = vsub.f32 %v370_v23, %v371_v26  ;;  %v75_v35 = vpack.c.bf16 0.0, %v72_v25  ;;  %v379_v37 = vld [vmem:[%s748_s0 + $0x50] sm:$0xff] }
   0xa   :  { %v374_v28 = vld [vmem:[%s749_s1 + $0x40] sm:$0xff]  ;;  %v380_v38 = vld [vmem:[%s749_s1 + $0x50] sm:$0xff]  ;;  %360 = vst [vmem:[%s750_s2 + $0x48] sm:$0xf] %v42_v24  ;;  %v409_v9 = vld [vmem:[%s748_s0 + $0x28] sm:$0xff]  ;;  %v215_v11 = vsub.f32 %v406_v5, %v407_v8  ;;  %v196_v26 = vpack.c.bf16 0.0, %v193_v2 }
   0xb   :  { %v64_v30 = vpack.c.bf16 0.0, %v61_v20  ;;  %v94_v32 = vsub.f32 %v373_v27, %v374_v28  ;;  %v376_v33 = vld [vmem:[%s748_s0 + $0xc0] sm:$0xff]  ;;  %v382_v39 = vld [vmem:[%s748_s0 + $0xd0] sm:$0xff]  ;;  %v86_v40 = vpack.c.bf16 0.0, %v83_v31  ;;  %v116_v41 = vsub.f32 %v379_v37, %v380_v38  ;;  %363 = vst [vmem:[%s750_s2 + $0x10] sm:$0xf] %v53_v29 }
   0xc   :  { %v377_v34 = vld [vmem:[%s749_s1 + $0xc0] sm:$0xff]  ;;  %v383_v42 = vld [vmem:[%s749_s1 + $0xd0] sm:$0xff]  ;;  %369 = vst [vmem:[%s750_s2 + $0x18] sm:$0xf] %v75_v35  ;;  %v410_v12 = vld [vmem:[%s749_s1 + $0x28] sm:$0xff]  ;;  %v207_v31 = vpack.c.bf16 0.0, %v204_v7 }
   0xd   :  { %v105_v36 = vsub.f32 %v376_v33, %v377_v34  ;;  %v385_v43 = vld [vmem:[%s748_s0 + $0x60] sm:$0xff]  ;;  %v97_v44 = vpack.c.bf16 0.0, %v94_v32  ;;  %v127_v45 = vsub.f32 %v382_v39, %v383_v42  ;;  %366 = vst [vmem:[%s750_s2 + $0x50] sm:$0xf] %v64_v30  ;;  %v391_v52 = vld [vmem:[%s748_s0 + $0x70] sm:$0xff]  ;;  %v119_v55 = vpack.c.bf16 0.0, %v116_v41 }
   0xe   :  { %v386_v46 = vld [vmem:[%s749_s1 + $0x60] sm:$0xff]  ;;  %v392_v53 = vld [vmem:[%s749_s1 + $0x70] sm:$0xff]  ;;  %372 = vst [vmem:[%s750_s2 + $0x58] sm:$0xf] %v86_v40  ;;  %v412_v13 = vld [vmem:[%s748_s0 + $0xa8] sm:$0xff]  ;;  %v226_v16 = vsub.f32 %v409_v9, %v410_v12 }
   0xf   :  { %v388_v47 = vld [vmem:[%s748_s0 + $0xe0] sm:$0xff]  ;;  %v108_v49 = vpack.c.bf16 0.0, %v105_v36  ;;  %v138_v50 = vsub.f32 %v385_v43, %v386_v46  ;;  %v394_v54 = vld [vmem:[%s748_s0 + $0xf0] sm:$0xff]  ;;  %v160_v56 = vsub.f32 %v391_v52, %v392_v53  ;;  %v130_v60 = vpack.c.bf16 0.0, %v127_v45  ;;  %375 = vst [vmem:[%s750_s2 + $0x20] sm:$0xf] %v97_v44 }
  0x10   :  { %v389_v48 = vld [vmem:[%s749_s1 + $0xe0] sm:$0xff]  ;;  %v395_v57 = vld [vmem:[%s749_s1 + $0xf0] sm:$0xff]  ;;  %381 = vst [vmem:[%s750_s2 + $0x28] sm:$0xf] %v119_v55  ;;  %v413_v14 = vld [vmem:[%s749_s1 + $0xa8] sm:$0xff]  ;;  %v218_v36 = vpack.c.bf16 0.0, %v215_v11 }
  0x11   :  { %v149_v51 = vsub.f32 %v388_v47, %v389_v48  ;;  %v171_v61 = vsub.f32 %v394_v54, %v395_v57  ;;  %v141_v1 = vpack.c.bf16 0.0, %v138_v50  ;;  %378 = vst [vmem:[%s750_s2 + $0x60] sm:$0xf] %v108_v49  ;;  %v163_v10 = vpack.c.bf16 0.0, %v160_v56  ;;  %v415_v18 = vld [vmem:[%s748_s0 + $0x38] sm:$0xff]  ;;  %v421_v24 = vld [vmem:[%s748_s0 + $0x48] sm:$0xff] }
  0x12   :  { %384 = vst [vmem:[%s750_s2 + $0x68] sm:$0xf] %v130_v60  ;;  %v237_v17 = vsub.f32 %v412_v13, %v413_v14  ;;  %v416_v19 = vld [vmem:[%s749_s1 + $0x38] sm:$0xff]  ;;  %v422_v25 = vld [vmem:[%s749_s1 + $0x48] sm:$0xff]  ;;  %v229_v40 = vpack.c.bf16 0.0, %v226_v16 }
  0x13   :  { %v152_v6 = vpack.c.bf16 0.0, %v149_v51  ;;  %v174_v15 = vpack.c.bf16 0.0, %v171_v61  ;;  %v418_v20 = vld [vmem:[%s748_s0 + $0xb8] sm:$0xff]  ;;  %387 = vst [vmem:[%s750_s2 + $0x30] sm:$0xf] %v141_v1  ;;  %v248_v22 = vsub.f32 %v415_v18, %v416_v19  ;;  %v270_v28 = vsub.f32 %v421_v24, %v422_v25  ;;  %v424_v29 = vld [vmem:[%s748_s0 + $0xc8] sm:$0xff] }
  0x14   :  { %v419_v23 = vld [vmem:[%s749_s1 + $0xb8] sm:$0xff]  ;;  %v425_v30 = vld [vmem:[%s749_s1 + $0xc8] sm:$0xff]  ;;  %393 = vst [vmem:[%s750_s2 + $0x38] sm:$0xf] %v163_v10  ;;  %v240_v45 = vpack.c.bf16 0.0, %v237_v17 }
  0x15   :  { %390 = vst [vmem:[%s750_s2 + $0x70] sm:$0xf] %v152_v6  ;;  %v259_v27 = vsub.f32 %v418_v20, %v419_v23  ;;  %v281_v32 = vsub.f32 %v424_v29, %v425_v30  ;;  %v427_v33 = vld [vmem:[%s748_s0 + $0x58] sm:$0xff]  ;;  %v433_v39 = vld [vmem:[%s748_s0 + $0x68] sm:$0xff]  ;;  %v251_v51 = vpack.c.bf16 0.0, %v248_v22  ;;  %v273_v56 = vpack.c.bf16 0.0, %v270_v28 }
  0x16   :  { %v428_v34 = vld [vmem:[%s749_s1 + $0x58] sm:$0xff]  ;;  %396 = vst [vmem:[%s750_s2 + $0x78] sm:$0xf] %v174_v15  ;;  %v434_v42 = vld [vmem:[%s749_s1 + $0x68] sm:$0xff] }
  0x17   :  { %v430_v35 = vld [vmem:[%s748_s0 + $0xd8] sm:$0xff]  ;;  %v292_v37 = vsub.f32 %v427_v33, %v428_v34  ;;  %399 = vst [vmem:[%s750_s2 + $0x4] sm:$0xf] %v185_v21  ;;  %v436_v43 = vld [vmem:[%s748_s0 + $0xe8] sm:$0xff]  ;;  %v314_v46 = vsub.f32 %v433_v39, %v434_v42  ;;  %v262_v54 = vpack.c.bf16 0.0, %v259_v27  ;;  %v284_v57 = vpack.c.bf16 0.0, %v281_v32 }
  0x18   :  { %v431_v38 = vld [vmem:[%s749_s1 + $0xd8] sm:$0xff]  ;;  %v437_v44 = vld [vmem:[%s749_s1 + $0xe8] sm:$0xff]  ;;  %402 = vst [vmem:[%s750_s2 + $0x44] sm:$0xf] %v196_v26 }
  0x19   :  { %v303_v41 = vsub.f32 %v430_v35, %v431_v38  ;;  %v325_v47 = vsub.f32 %v436_v43, %v437_v44  ;;  %v439_v48 = vld [vmem:[%s748_s0 + $0x78] sm:$0xff]  ;;  %405 = vst [vmem:[%s750_s2 + $0xc] sm:$0xf] %v207_v31  ;;  %v295_v58 = vpack.c.bf16 0.0, %v292_v37  ;;  %v317_v60 = vpack.c.bf16 0.0, %v314_v46 }
  0x1a   :  { %v440_v49 = vld [vmem:[%s749_s1 + $0x78] sm:$0xff]  ;;  %408 = vst [vmem:[%s750_s2 + $0x4c] sm:$0xf] %v218_v36 }
  0x1b   :  { %v442_v50 = vld [vmem:[%s748_s0 + $0xf8] sm:$0xff]  ;;  %v336_v52 = vsub.f32 %v439_v48, %v440_v49  ;;  %411 = vst [vmem:[%s750_s2 + $0x14] sm:$0xf] %v229_v40  ;;  %v306_v59 = vpack.c.bf16 0.0, %v303_v41  ;;  %v328_v61 = vpack.c.bf16 0.0, %v325_v47 }
  0x1c   :  { %v443_v53 = vld [vmem:[%s749_s1 + $0xf8] sm:$0xff]  ;;  %414 = vst [vmem:[%s750_s2 + $0x54] sm:$0xf] %v240_v45 }
  0x1d   :  { %v347_v55 = vsub.f32 %v442_v50, %v443_v53  ;;  %417 = vst [vmem:[%s750_s2 + $0x1c] sm:$0xf] %v251_v51  ;;  %v339_v62 = vpack.c.bf16 0.0, %v336_v52 }
  0x1e   :  { %420 = vst [vmem:[%s750_s2 + $0x5c] sm:$0xf] %v262_v54 }
  0x1f   :  { %423 = vst [vmem:[%s750_s2 + $0x24] sm:$0xf] %v273_v56  ;;  %v350_v63 = vpack.c.bf16 0.0, %v347_v55 }
  0x20   :  { %426 = vst [vmem:[%s750_s2 + $0x64] sm:$0xf] %v284_v57 }
  0x21   :  { %429 = vst [vmem:[%s750_s2 + $0x2c] sm:$0xf] %v295_v58 }
  0x22   :  { %432 = vst [vmem:[%s750_s2 + $0x6c] sm:$0xf] %v306_v59 }
  0x23   :  { %435 = vst [vmem:[%s750_s2 + $0x34] sm:$0xf] %v317_v60 }
  0x24   :  { %438 = vst [vmem:[%s750_s2 + $0x74] sm:$0xf] %v328_v61 }
  0x25   :  { %441 = vst [vmem:[%s750_s2 + $0x3c] sm:$0xf] %v339_v62 }
  0x26   :  { %444 = vst [vmem:[%s750_s2 + $0x7c] sm:$0xf] %v350_v63 }

</bundles_post_ra>
